<compile_context>
chip_gen: v5e
topology: v5e:2x2
jax: 0.10.0
libtpu: 0.0.40
codegen_flags: <defaults>
</compile_context>

<pallas_src>
import math

import jax
import jax.numpy as jnp
from jax.experimental import pallas as pl
from jax.experimental.pallas import tpu as pltpu

_WIDE_LANES = 512        # 4 full vregs wide -> large unmasked stores
_MIN_LANES = 128         # minimum lane-dense width
_MAX_BLOCK_ROWS = 512    # 512 x 512 f32 out = 1 MiB per block buffer


def _round_up(x, m):
    return ((x + m - 1) // m) * m


def _tofp32_kernel(x_ref, o_ref):
    # Pure elementwise cast; VPU-only, memory bound.
    o_ref[...] = x_ref[...].astype(jnp.float32)


def tofp32(x):
    """Equivalent of torch `input.float()`: cast any array to float32.

    The cast runs in a Pallas kernel on a lane-dense (rows, W) view of the
    flattened input (W a multiple of 128); the reshapes around it are free
    layout plumbing.
    """
    orig_shape = x.shape
    n = math.prod(orig_shape) if orig_shape else 1
    n = max(n, 1)

    flat = jnp.reshape(x, (-1,))

    # Pick the lane width: wide (512) for anything non-trivial, 128 otherwise.
    lanes = _WIDE_LANES if n >= _WIDE_LANES * 8 else _MIN_LANES

    # View as (rows, lanes); pad rows so the block evenly tiles the slab and
    # the block stays (8, 128)-aligned.
    rows = max(pl.cdiv(n, lanes), 1)
    rows = _round_up(rows, 8)
    block_rows = min(_MAX_BLOCK_ROWS, rows)
    rows_p = _round_up(rows, block_rows)

    pad = rows_p * lanes - n
    if pad:
        flat = jnp.pad(flat, (0, pad))
    x2 = flat.reshape(rows_p, lanes)

    grid = (rows_p // block_rows,)
    out = pl.pallas_call(
        _tofp32_kernel,
        out_shape=jax.ShapeDtypeStruct((rows_p, lanes), jnp.float32),
        grid_spec=pltpu.PrefetchScalarGridSpec(
            num_scalar_prefetch=0,
            grid=grid,
            in_specs=[pl.BlockSpec((block_rows, lanes), lambda i: (i, 0))],
            out_specs=pl.BlockSpec((block_rows, lanes), lambda i: (i, 0)),
        ),
        compiler_params=pltpu.CompilerParams(
            dimension_semantics=("parallel",)),
    )(x2)

    return out.reshape(-1)[:n].reshape(orig_shape)


if __name__ == "__main__":
    # The module accepts any tensor; use a half-precision NCHW activation
    # (the typical use of tofp32 wrappers) at a small shape.
    key = jax.random.PRNGKey(0)
    x = jax.random.normal(key, (2, 4, 16, 16), dtype=jnp.float32).astype(jnp.bfloat16)

    fwd = jax.jit(tofp32)
    y = fwd(x)
    y = jax.block_until_ready(y)

    assert y.shape == x.shape, y.shape
    assert y.dtype == jnp.float32, y.dtype
    assert bool(jnp.all(jnp.isfinite(y)))
    # Exact match with the reference cast (bf16 -> f32 is lossless).
    ref = x.astype(jnp.float32)
    assert bool(jnp.all(y == ref))
    print("KERNEL_OK")
</pallas_src>

<mosaic_0001>
module attributes {stable_mosaic.version = 11 : i64} {
  func.func @_tofp32_kernel(%arg0: i32, %arg1: memref<16x128xbf16, #tpu.memory_space<vmem>>, %arg2: memref<16x128xf32, #tpu.memory_space<vmem>>) attributes {dimension_semantics = [#tpu.dimension_semantics<parallel>], iteration_bounds = array<i64: 1>, scalar_prefetch = 0 : i64, scratch_operands = 0 : i64, tpu.core_type = #tpu.core_type<tc>, window_params = [{transform_indices = @transform_0, window_bounds = array<i64: 16, 128>}, {transform_indices = @transform_1, window_bounds = array<i64: 16, 128>}]} {
    %c0 = arith.constant 0 : index
    %c0_0 = arith.constant 0 : index
    %0 = vector.load %arg1[%c0, %c0_0] : memref<16x128xbf16, #tpu.memory_space<vmem>>, vector<16x128xbf16>
    %1 = arith.extf %0 : vector<16x128xbf16> to vector<16x128xf32>
    %c0_1 = arith.constant 0 : index
    %c0_2 = arith.constant 0 : index
    %2 = vector.load %arg2[%c0_1, %c0_2] : memref<16x128xf32, #tpu.memory_space<vmem>>, vector<16x128xf32>
    tpu.vector_store %arg2[%c0_1, %c0_2], %1 {strides = array<i32>} : memref<16x128xf32, #tpu.memory_space<vmem>>, vector<16x128xf32>,
    return
  }
  func.func @transform_0(%arg0: i32) -> (i32, i32) {
    %c0_i32 = arith.constant 0 : i32
    %c0_i32_0 = arith.constant 0 : i32
    return %arg0, %c0_i32 : i32, i32
  }
  func.func @transform_1(%arg0: i32) -> (i32, i32) {
    %c0_i32 = arith.constant 0 : i32
    %c0_i32_0 = arith.constant 0 : i32
    return %arg0, %c0_i32 : i32, i32
  }
}

</mosaic_0001>

<bundles_post_ra>
// kernel: tofp32.1
= control target key start
LH: loop header
LB: loop body
LE: loop exit
PB: predicated region body
PF: predicated region fallthrough
CT: control target
= control target key end

     0   :  { %s41_s0 = inlined_call_operand.vmem [shape: bf16[16,128], index: 0, kind: input, shape index: {}]   ;;  %s42_s1 = inlined_call_operand.vmem [shape: f32[16,128], index: 1, kind: output, shape index: {}]  }
   0x1   :  { %v19_v0 = vld [vmem:[%s41_s0] sm:$0xff]  }
   0x2   :  { %v20_v1 = vunpack.c.l.bf16 %v19_v0  ;;  %v21_v2 = vunpack.c.h.bf16 %v19_v0 }
   0x4   :  { %12 = vst [vmem:[%s42_s1] sm:$0xff] %v20_v1 }
   0x5   :  { %13 = vst [vmem:[%s42_s1 + $0x8] sm:$0xff] %v21_v2 }

</bundles_post_ra>
